<compile_context>
chip_gen: v6e
topology: v6e:2x2x1
jax: 0.10.0
libtpu: 0.0.40
codegen_flags: <defaults>
</compile_context>

<pallas_src>
import jax
import jax.numpy as jnp
from jax import lax
from jax.experimental import pallas as pl
from jax.experimental.pallas import tpu as pltpu

_NEG_INF = -1e30


def _round_up(x, m):
    return (x + m - 1) // m * m


# ----------------------- Phase 1: recurrence over time -----------------------

def _make_recurrence_kernel(tt, t_valid):
    """tt: timesteps per grid block (static). t_valid: true sequence length."""
    needs_mask = (t_valid % tt) != 0

    def kernel(x_ref, h0_ref, w1x_ref, w1h_ref, b1_ref,
               h_seq_ref, hT_ref, h_sc):
        blk = pl.program_id(0)

        @pl.when(blk == 0)
        def _init():
            h_sc[...] = h0_ref[...].astype(jnp.float32)

        cdt = w1h_ref.dtype

        def step(s, carry):
            h_prev = h_sc[...]                                    # f32 carry
            x_t = x_ref[s]                                        # (BP, IPp)
            h_new = (
                jnp.dot(x_t, w1x_ref[...],
                        preferred_element_type=jnp.float32)
                + jnp.dot(h_prev.astype(cdt), w1h_ref[...],
                          preferred_element_type=jnp.float32)
                + b1_ref[...]
            )
            if needs_mask:
                # Steps beyond the true sequence length must not advance h.
                valid = (blk * tt + s) < t_valid
                h_next = jnp.where(valid, h_new, h_prev)
            else:
                h_next = h_new
            h_sc[...] = h_next
            h_seq_ref[s] = h_new.astype(h_seq_ref.dtype)
            return carry

        lax.fori_loop(0, tt, step, 0, unroll=True)

        @pl.when(blk == pl.num_programs(0) - 1)
        def _finalize():
            hT_ref[...] = h_sc[...].astype(hT_ref.dtype)

    return kernel


# ------------------ Phase 2: i2o projection + log-softmax -------------------

def _proj_logsoftmax_kernel(h_ref, w2_ref, b2_ref, out_ref):
    # Padded output columns carry a -1e30 bias, so exp() underflows to 0 and
    # they drop out of the log-sum-exp automatically (no extra masking ops).
    logits = (
        jnp.dot(h_ref[...].astype(w2_ref.dtype), w2_ref[...],
                preferred_element_type=jnp.float32)
        + b2_ref[...]
    )
    m = jnp.max(logits, axis=1, keepdims=True)
    lse = m + jnp.log(jnp.sum(jnp.exp(logits - m), axis=1, keepdims=True))
    out_ref[...] = (logits - lse).astype(out_ref.dtype)


# ------------------------------ Parameter prep ------------------------------

def prepare_params(w_i2h, b_i2h, w_i2o, b_i2o,
                   input_size, hidden_size, output_size,
                   compute_dtype=jnp.float32):
    """One-time prep: transpose, split i2h into (x, h) parts, pad lane-dense.

    w_i2h: (hidden, input+hidden) torch layout; w_i2o: (output, hidden).
    """
    sub = 8 if jnp.dtype(compute_dtype).itemsize == 4 else 16
    IPp = _round_up(input_size, sub)          # small sublane pad only (not 128)
    HP = _round_up(hidden_size, 128)
    OP = _round_up(output_size, 128)

    w1x = jnp.zeros((IPp, HP), compute_dtype).at[:input_size, :hidden_size].set(
        w_i2h[:, :input_size].T.astype(compute_dtype))
    w1h = jnp.zeros((HP, HP), compute_dtype).at[:hidden_size, :hidden_size].set(
        w_i2h[:, input_size:].T.astype(compute_dtype))

    b1 = jnp.zeros((1, HP), jnp.float32).at[0, :hidden_size].set(
        b_i2h.astype(jnp.float32))

    w2 = jnp.zeros((HP, OP), compute_dtype).at[:hidden_size, :output_size].set(
        w_i2o.T.astype(compute_dtype))

    # Padded output columns get a huge negative bias -> excluded from softmax.
    b2 = jnp.full((1, OP), _NEG_INF, jnp.float32).at[0, :output_size].set(
        b_i2o.astype(jnp.float32))

    return {
        "w1x": w1x, "w1h": w1h, "b1": b1, "w2": w2, "b2": b2,
        "dims": (input_size, hidden_size, output_size, IPp, HP, OP),
        "compute_dtype": compute_dtype,
    }


# --------------------------------- Wrappers ----------------------------------

def elman_rnn_sequence(params, x_seq, h0, *,
                       steps_per_block=32, rows_per_block=256):
    """Run the Elman cell over a whole sequence.

    x_seq: (T, B, input_size), h0: (B, hidden_size).
    Returns (out_seq (T, B, output_size) log-probs, h_T (B, hidden_size)).
    """
    input_size, hidden_size, output_size, IPp, HP, OP = params["dims"]
    cdt = params["compute_dtype"]
    T, B, _ = x_seq.shape

    sub = 8 if jnp.dtype(cdt).itemsize == 4 else 16   # full sublane tile
    BP = _round_up(B, sub)

    TT = min(steps_per_block, T)                      # timesteps per grid step
    NB = (T + TT - 1) // TT
    T_pad = NB * TT

    # Streamed x: natural lane width (sublane-rounded), time padded to T_pad.
    x_p = jnp.zeros((T_pad, BP, IPp), cdt).at[:T, :B, :input_size].set(
        x_seq.astype(cdt))
    h0_p = jnp.zeros((BP, HP), cdt).at[:B, :hidden_size].set(h0.astype(cdt))
    b1_bc = jnp.broadcast_to(params["b1"], (BP, HP))  # pre-broadcast once

    rec_kernel = _make_recurrence_kernel(TT, T)

    rec_grid = pltpu.PrefetchScalarGridSpec(
        num_scalar_prefetch=0,
        grid=(NB,),
        in_specs=[
            pl.BlockSpec((TT, BP, IPp), lambda b: (b, 0, 0)),   # x    (streamed)
            pl.BlockSpec((BP, HP), lambda b: (0, 0)),           # h0   (resident)
            pl.BlockSpec((IPp, HP), lambda b: (0, 0)),          # W1x  (resident)
            pl.BlockSpec((HP, HP), lambda b: (0, 0)),           # W1h  (resident)
            pl.BlockSpec((BP, HP), lambda b: (0, 0)),           # b1   (resident)
        ],
        out_specs=(
            pl.BlockSpec((TT, BP, HP), lambda b: (b, 0, 0)),    # h_seq (streamed)
            pl.BlockSpec((BP, HP), lambda b: (0, 0)),           # h_T   (resident)
        ),
        scratch_shapes=[pltpu.VMEM((BP, HP), jnp.float32)],     # f32 hidden carry
    )

    h_seq_p, hT_p = pl.pallas_call(
        rec_kernel,
        out_shape=(
            jax.ShapeDtypeStruct((T_pad, BP, HP), cdt),
            jax.ShapeDtypeStruct((BP, HP), jnp.float32),
        ),
        grid_spec=rec_grid,
        compiler_params=pltpu.CompilerParams(
            dimension_semantics=("arbitrary",),   # time carries the hidden state
        ),
    )(x_p, h0_p, params["w1x"], params["w1h"], b1_bc)

    # ---- Batched i2o + log-softmax over all T*BP rows (off the serial path) --
    rows = T * BP
    RB = min(rows_per_block, rows)                 # rows is a multiple of 8
    rows_pad = _round_up(rows, RB)

    h2d = h_seq_p[:T].reshape(rows, HP)
    if rows_pad != rows:
        h2d = jnp.zeros((rows_pad, HP), h2d.dtype).at[:rows].set(h2d)

    proj_grid = pltpu.PrefetchScalarGridSpec(
        num_scalar_prefetch=0,
        grid=(rows_pad // RB,),
        in_specs=[
            pl.BlockSpec((RB, HP), lambda i: (i, 0)),           # h rows (streamed)
            pl.BlockSpec((HP, OP), lambda i: (0, 0)),           # W2 (resident)
            pl.BlockSpec((1, OP), lambda i: (0, 0)),            # b2 (resident)
        ],
        out_specs=pl.BlockSpec((RB, OP), lambda i: (i, 0)),
    )

    out_p = pl.pallas_call(
        _proj_logsoftmax_kernel,
        out_shape=jax.ShapeDtypeStruct((rows_pad, OP), jnp.float32),
        grid_spec=proj_grid,
        compiler_params=pltpu.CompilerParams(
            dimension_semantics=("parallel",),   # independent rows; megacore-able
        ),
    )(h2d, params["w2"], params["b2"])

    out_seq = out_p[:rows].reshape(T, BP, OP)[:, :B, :output_size]
    hT = hT_p[:B, :hidden_size]
    return out_seq, hT


def elman_rnn_forward(params, x, h):
    """Single-step forward, identical to the PyTorch module's forward()."""
    out_seq, h_new = elman_rnn_sequence(params, x[None], h)
    return out_seq[0], h_new


def _init_linear(key, out_features, in_features):
    # Mimic torch.nn.Linear default init: U(-1/sqrt(fan_in), 1/sqrt(fan_in)).
    kw, kb = jax.random.split(key)
    bound = 1.0 / (in_features ** 0.5)
    w = jax.random.uniform(kw, (out_features, in_features),
                           minval=-bound, maxval=bound, dtype=jnp.float32)
    b = jax.random.uniform(kb, (out_features,),
                           minval=-bound, maxval=bound, dtype=jnp.float32)
    return w, b


if __name__ == "__main__":
    input_size, hidden_size, output_size = 16, 32, 8
    batch, seq_len = 2, 8

    key = jax.random.PRNGKey(0)
    k_x, k_i2h, k_i2o = jax.random.split(key, 3)

    x_seq = jax.random.normal(k_x, (seq_len, batch, input_size),
                              dtype=jnp.float32)
    h0 = jnp.zeros((batch, hidden_size), dtype=jnp.float32)  # initHidden-like

    w_i2h, b_i2h = _init_linear(k_i2h, hidden_size, input_size + hidden_size)
    w_i2o, b_i2o = _init_linear(k_i2o, output_size, hidden_size)

    # ---- f32 path: exact semantics check against the PyTorch math ----------
    params = prepare_params(w_i2h, b_i2h, w_i2o, b_i2o,
                            input_size, hidden_size, output_size,
                            compute_dtype=jnp.float32)

    out_seq, h_T = jax.block_until_ready(
        elman_rnn_sequence(params, x_seq, h0))

    # Plain-JAX reference: unrolled loop of the exact PyTorch cell math.
    h_ref = h0
    outs_ref = []
    for t in range(seq_len):
        combined = jnp.concatenate([x_seq[t], h_ref], axis=1)
        h_ref = combined @ w_i2h.T + b_i2h
        logits = h_ref @ w_i2o.T + b_i2o
        outs_ref.append(
            logits - jax.scipy.special.logsumexp(logits, axis=1, keepdims=True))
    out_ref_seq = jnp.stack(outs_ref)

    assert jnp.allclose(h_T, h_ref, atol=1e-4), "hidden mismatch (sequence)"
    assert jnp.allclose(out_seq, out_ref_seq, atol=1e-4), \
        "output mismatch (sequence)"

    # Single-step module forward (T=1) matches step 0 of the reference.
    out1, h1 = jax.block_until_ready(elman_rnn_forward(params, x_seq[0], h0))
    assert jnp.allclose(out1, out_ref_seq[0], atol=1e-4), \
        "output mismatch (single step)"
    combined0 = jnp.concatenate([x_seq[0], h0], axis=1)
    assert jnp.allclose(h1, combined0 @ w_i2h.T + b_i2h, atol=1e-4), \
        "hidden mismatch (single step)"

    # ---- bf16 path (v6e/v7x MXU): bf16 weights/streams, f32 hidden carry ----
    params_bf16 = prepare_params(w_i2h, b_i2h, w_i2o, b_i2o,
                                 input_size, hidden_size, output_size,
                                 compute_dtype=jnp.bfloat16)
    out_bf, h_bf = jax.block_until_ready(
        elman_rnn_sequence(params_bf16, x_seq, h0))
    assert bool(jnp.all(jnp.isfinite(out_bf))) and bool(jnp.all(jnp.isfinite(h_bf)))
    # f32 carry keeps the recurrence stable -> loose agreement with f32 reference.
    assert jnp.allclose(h_bf, h_ref, atol=0.25, rtol=0.1), \
        "bf16 hidden drifted too far from f32 reference"

    print("KERNEL_OK")
</pallas_src>

<mosaic_0001>
module attributes {stable_mosaic.version = 11 : i64} {
  func.func @kernel(%arg0: i32, %arg1: memref<8x8x16xf32, #tpu.memory_space<vmem>>, %arg2: memref<8x128xf32, #tpu.memory_space<vmem>>, %arg3: memref<16x128xf32, #tpu.memory_space<vmem>>, %arg4: memref<128x128xf32, #tpu.memory_space<vmem>>, %arg5: memref<8x128xf32, #tpu.memory_space<vmem>>, %arg6: memref<8x8x128xf32, #tpu.memory_space<vmem>>, %arg7: memref<8x128xf32, #tpu.memory_space<vmem>>, %arg8: memref<8x128xf32, #tpu.memory_space<vmem>>) attributes {dimension_semantics = [#tpu.dimension_semantics<arbitrary>], iteration_bounds = array<i64: 1>, scalar_prefetch = 0 : i64, scratch_operands = 1 : i64, tpu.core_type = #tpu.core_type<tc>, window_params = [{transform_indices = @transform_0, window_bounds = array<i64: 8, 8, 16>}, {pipeline_mode = #tpu.pipeline_mode<synchronous>, transform_indices = @transform_1, window_bounds = array<i64: 8, 128>}, {pipeline_mode = #tpu.pipeline_mode<synchronous>, transform_indices = @transform_2, window_bounds = array<i64: 16, 128>}, {pipeline_mode = #tpu.pipeline_mode<synchronous>, transform_indices = @transform_3, window_bounds = array<i64: 128, 128>}, {pipeline_mode = #tpu.pipeline_mode<synchronous>, transform_indices = @transform_4, window_bounds = array<i64: 8, 128>}, {transform_indices = @transform_5, window_bounds = array<i64: 8, 8, 128>}, {pipeline_mode = #tpu.pipeline_mode<synchronous>, transform_indices = @transform_6, window_bounds = array<i64: 8, 128>}]} {
    %c0_i32 = arith.constant 0 : i32
    %0 = arith.cmpi eq, %arg0, %c0_i32 : i32
    %1 = arith.extui %0 : i1 to i32
    %c0_i32_0 = arith.constant 0 : i32
    %2 = arith.cmpi ne, %1, %c0_i32_0 : i32
    scf.if %2 {
      %c0_130 = arith.constant 0 : index
      %c0_131 = arith.constant 0 : index
      %134 = vector.load %arg2[%c0_130, %c0_131] : memref<8x128xf32, #tpu.memory_space<vmem>>, vector<8x128xf32>
      %c0_132 = arith.constant 0 : index
      %c0_133 = arith.constant 0 : index
      %135 = vector.load %arg8[%c0_132, %c0_133] : memref<8x128xf32, #tpu.memory_space<vmem>>, vector<8x128xf32>
      tpu.vector_store %arg8[%c0_132, %c0_133], %134 {strides = array<i32>} : memref<8x128xf32, #tpu.memory_space<vmem>>, vector<8x128xf32>,
    } else {
    }
    %c0_i32_1 = arith.constant 0 : i32
    %c0 = arith.constant 0 : index
    %c0_2 = arith.constant 0 : index
    %3 = vector.load %arg8[%c0, %c0_2] : memref<8x128xf32, #tpu.memory_space<vmem>>, vector<8x128xf32>
    %4 = arith.index_cast %c0_i32_1 : i32 to index
    %c0_3 = arith.constant 0 : index
    %c0_4 = arith.constant 0 : index
    %5 = vector.load %arg1[%4, %c0_3, %c0_4] : memref<8x8x16xf32, #tpu.memory_space<vmem>>, vector<1x8x16xf32>
    %6 = vector.shape_cast %5 : vector<1x8x16xf32> to vector<8x16xf32>
    %c0_5 = arith.constant 0 : index
    %c0_6 = arith.constant 0 : index
    %7 = vector.load %arg3[%c0_5, %c0_6] : memref<16x128xf32, #tpu.memory_space<vmem>>, vector<16x128xf32>
    %cst = arith.constant dense<0.000000e+00> : vector<8x128xf32>
    %8 = tpu.matmul %6, %7, %cst {dimension_numbers = #tpu.dot_dimension_numbers<[1], [0], [0], [1], [0, 0, 1, 1], [], []>} : vector<8x16xf32>, vector<16x128xf32>, vector<8x128xf32> -> vector<8x128xf32>
    %c0_7 = arith.constant 0 : index
    %c0_8 = arith.constant 0 : index
    %9 = vector.load %arg4[%c0_7, %c0_8] : memref<128x128xf32, #tpu.memory_space<vmem>>, vector<128x128xf32>
    %cst_9 = arith.constant dense<0.000000e+00> : vector<8x128xf32>
    %10 = tpu.matmul %3, %9, %cst_9 {dimension_numbers = #tpu.dot_dimension_numbers<[1], [0], [0], [1], [0, 0, 1, 1], [], []>} : vector<8x128xf32>, vector<128x128xf32>, vector<8x128xf32> -> vector<8x128xf32>
    %11 = arith.addf %8, %10 : vector<8x128xf32>
    %c0_10 = arith.constant 0 : index
    %c0_11 = arith.constant 0 : index
    %12 = vector.load %arg5[%c0_10, %c0_11] : memref<8x128xf32, #tpu.memory_space<vmem>>, vector<8x128xf32>
    %13 = arith.addf %11, %12 : vector<8x128xf32>
    %c0_12 = arith.constant 0 : index
    %c0_13 = arith.constant 0 : index
    %14 = vector.load %arg8[%c0_12, %c0_13] : memref<8x128xf32, #tpu.memory_space<vmem>>, vector<8x128xf32>
    tpu.vector_store %arg8[%c0_12, %c0_13], %13 {strides = array<i32>} : memref<8x128xf32, #tpu.memory_space<vmem>>, vector<8x128xf32>,
    %15 = arith.index_cast %c0_i32_1 : i32 to index
    %c0_14 = arith.constant 0 : index
    %c0_15 = arith.constant 0 : index
    %16 = vector.load %arg6[%15, %c0_14, %c0_15] : memref<8x8x128xf32, #tpu.memory_space<vmem>>, vector<1x8x128xf32>
    %17 = vector.shape_cast %16 : vector<1x8x128xf32> to vector<8x128xf32>
    %18 = vector.shape_cast %13 : vector<8x128xf32> to vector<1x8x128xf32>
    tpu.vector_store %arg6[%15, %c0_14, %c0_15], %18 {strides = array<i32>} : memref<8x8x128xf32, #tpu.memory_space<vmem>>, vector<1x8x128xf32>,
    %c1_i32 = arith.constant 1 : i32
    %c0_16 = arith.constant 0 : index
    %c0_17 = arith.constant 0 : index
    %19 = vector.load %arg8[%c0_16, %c0_17] : memref<8x128xf32, #tpu.memory_space<vmem>>, vector<8x128xf32>
    %20 = arith.index_cast %c1_i32 : i32 to index
    %c0_18 = arith.constant 0 : index
    %c0_19 = arith.constant 0 : index
    %21 = vector.load %arg1[%20, %c0_18, %c0_19] : memref<8x8x16xf32, #tpu.memory_space<vmem>>, vector<1x8x16xf32>
    %22 = vector.shape_cast %21 : vector<1x8x16xf32> to vector<8x16xf32>
    %c0_20 = arith.constant 0 : index
    %c0_21 = arith.constant 0 : index
    %23 = vector.load %arg3[%c0_20, %c0_21] : memref<16x128xf32, #tpu.memory_space<vmem>>, vector<16x128xf32>
    %cst_22 = arith.constant dense<0.000000e+00> : vector<8x128xf32>
    %24 = tpu.matmul %22, %23, %cst_22 {dimension_numbers = #tpu.dot_dimension_numbers<[1], [0], [0], [1], [0, 0, 1, 1], [], []>} : vector<8x16xf32>, vector<16x128xf32>, vector<8x128xf32> -> vector<8x128xf32>
    %c0_23 = arith.constant 0 : index
    %c0_24 = arith.constant 0 : index
    %25 = vector.load %arg4[%c0_23, %c0_24] : memref<128x128xf32, #tpu.memory_space<vmem>>, vector<128x128xf32>
    %cst_25 = arith.constant dense<0.000000e+00> : vector<8x128xf32>
    %26 = tpu.matmul %19, %25, %cst_25 {dimension_numbers = #tpu.dot_dimension_numbers<[1], [0], [0], [1], [0, 0, 1, 1], [], []>} : vector<8x128xf32>, vector<128x128xf32>, vector<8x128xf32> -> vector<8x128xf32>
    %27 = arith.addf %24, %26 : vector<8x128xf32>
    %c0_26 = arith.constant 0 : index
    %c0_27 = arith.constant 0 : index
    %28 = vector.load %arg5[%c0_26, %c0_27] : memref<8x128xf32, #tpu.memory_space<vmem>>, vector<8x128xf32>
    %29 = arith.addf %27, %28 : vector<8x128xf32>
    %c0_28 = arith.constant 0 : index
    %c0_29 = arith.constant 0 : index
    %30 = vector.load %arg8[%c0_28, %c0_29] : memref<8x128xf32, #tpu.memory_space<vmem>>, vector<8x128xf32>
    tpu.vector_store %arg8[%c0_28, %c0_29], %29 {strides = array<i32>} : memref<8x128xf32, #tpu.memory_space<vmem>>, vector<8x128xf32>,
    %31 = arith.index_cast %c1_i32 : i32 to index
    %c0_30 = arith.constant 0 : index
    %c0_31 = arith.constant 0 : index
    %32 = vector.load %arg6[%31, %c0_30, %c0_31] : memref<8x8x128xf32, #tpu.memory_space<vmem>>, vector<1x8x128xf32>
    %33 = vector.shape_cast %32 : vector<1x8x128xf32> to vector<8x128xf32>
    %34 = vector.shape_cast %29 : vector<8x128xf32> to vector<1x8x128xf32>
    tpu.vector_store %arg6[%31, %c0_30, %c0_31], %34 {strides = array<i32>} : memref<8x8x128xf32, #tpu.memory_space<vmem>>, vector<1x8x128xf32>,
    %c2_i32 = arith.constant 2 : i32
    %c0_32 = arith.constant 0 : index
    %c0_33 = arith.constant 0 : index
    %35 = vector.load %arg8[%c0_32, %c0_33] : memref<8x128xf32, #tpu.memory_space<vmem>>, vector<8x128xf32>
    %36 = arith.index_cast %c2_i32 : i32 to index
    %c0_34 = arith.constant 0 : index
    %c0_35 = arith.constant 0 : index
    %37 = vector.load %arg1[%36, %c0_34, %c0_35] : memref<8x8x16xf32, #tpu.memory_space<vmem>>, vector<1x8x16xf32>
    %38 = vector.shape_cast %37 : vector<1x8x16xf32> to vector<8x16xf32>
    %c0_36 = arith.constant 0 : index
    %c0_37 = arith.constant 0 : index
    %39 = vector.load %arg3[%c0_36, %c0_37] : memref<16x128xf32, #tpu.memory_space<vmem>>, vector<16x128xf32>
    %cst_38 = arith.constant dense<0.000000e+00> : vector<8x128xf32>
    %40 = tpu.matmul %38, %39, %cst_38 {dimension_numbers = #tpu.dot_dimension_numbers<[1], [0], [0], [1], [0, 0, 1, 1], [], []>} : vector<8x16xf32>, vector<16x128xf32>, vector<8x128xf32> -> vector<8x128xf32>
    %c0_39 = arith.constant 0 : index
    %c0_40 = arith.constant 0 : index
    %41 = vector.load %arg4[%c0_39, %c0_40] : memref<128x128xf32, #tpu.memory_space<vmem>>, vector<128x128xf32>
    %cst_41 = arith.constant dense<0.000000e+00> : vector<8x128xf32>
    %42 = tpu.matmul %35, %41, %cst_41 {dimension_numbers = #tpu.dot_dimension_numbers<[1], [0], [0], [1], [0, 0, 1, 1], [], []>} : vector<8x128xf32>, vector<128x128xf32>, vector<8x128xf32> -> vector<8x128xf32>
    %43 = arith.addf %40, %42 : vector<8x128xf32>
    %c0_42 = arith.constant 0 : index
    %c0_43 = arith.constant 0 : index
    %44 = vector.load %arg5[%c0_42, %c0_43] : memref<8x128xf32, #tpu.memory_space<vmem>>, vector<8x128xf32>
    %45 = arith.addf %43, %44 : vector<8x128xf32>
    %c0_44 = arith.constant 0 : index
    %c0_45 = arith.constant 0 : index
    %46 = vector.load %arg8[%c0_44, %c0_45] : memref<8x128xf32, #tpu.memory_space<vmem>>, vector<8x128xf32>
    tpu.vector_store %arg8[%c0_44, %c0_45], %45 {strides = array<i32>} : memref<8x128xf32, #tpu.memory_space<vmem>>, vector<8x128xf32>,
    %47 = arith.index_cast %c2_i32 : i32 to index
    %c0_46 = arith.constant 0 : index
    %c0_47 = arith.constant 0 : index
    %48 = vector.load %arg6[%47, %c0_46, %c0_47] : memref<8x8x128xf32, #tpu.memory_space<vmem>>, vector<1x8x128xf32>
    %49 = vector.shape_cast %48 : vector<1x8x128xf32> to vector<8x128xf32>
    %50 = vector.shape_cast %45 : vector<8x128xf32> to vector<1x8x128xf32>
    tpu.vector_store %arg6[%47, %c0_46, %c0_47], %50 {strides = array<i32>} : memref<8x8x128xf32, #tpu.memory_space<vmem>>, vector<1x8x128xf32>,
    %c3_i32 = arith.constant 3 : i32
    %c0_48 = arith.constant 0 : index
    %c0_49 = arith.constant 0 : index
    %51 = vector.load %arg8[%c0_48, %c0_49] : memref<8x128xf32, #tpu.memory_space<vmem>>, vector<8x128xf32>
    %52 = arith.index_cast %c3_i32 : i32 to index
    %c0_50 = arith.constant 0 : index
    %c0_51 = arith.constant 0 : index
    %53 = vector.load %arg1[%52, %c0_50, %c0_51] : memref<8x8x16xf32, #tpu.memory_space<vmem>>, vector<1x8x16xf32>
    %54 = vector.shape_cast %53 : vector<1x8x16xf32> to vector<8x16xf32>
    %c0_52 = arith.constant 0 : index
    %c0_53 = arith.constant 0 : index
    %55 = vector.load %arg3[%c0_52, %c0_53] : memref<16x128xf32, #tpu.memory_space<vmem>>, vector<16x128xf32>
    %cst_54 = arith.constant dense<0.000000e+00> : vector<8x128xf32>
    %56 = tpu.matmul %54, %55, %cst_54 {dimension_numbers = #tpu.dot_dimension_numbers<[1], [0], [0], [1], [0, 0, 1, 1], [], []>} : vector<8x16xf32>, vector<16x128xf32>, vector<8x128xf32> -> vector<8x128xf32>
    %c0_55 = arith.constant 0 : index
    %c0_56 = arith.constant 0 : index
    %57 = vector.load %arg4[%c0_55, %c0_56] : memref<128x128xf32, #tpu.memory_space<vmem>>, vector<128x128xf32>
    %cst_57 = arith.constant dense<0.000000e+00> : vector<8x128xf32>
    %58 = tpu.matmul %51, %57, %cst_57 {dimension_numbers = #tpu.dot_dimension_numbers<[1], [0], [0], [1], [0, 0, 1, 1], [], []>} : vector<8x128xf32>, vector<128x128xf32>, vector<8x128xf32> -> vector<8x128xf32>
    %59 = arith.addf %56, %58 : vector<8x128xf32>
    %c0_58 = arith.constant 0 : index
    %c0_59 = arith.constant 0 : index
    %60 = vector.load %arg5[%c0_58, %c0_59] : memref<8x128xf32, #tpu.memory_space<vmem>>, vector<8x128xf32>
    %61 = arith.addf %59, %60 : vector<8x128xf32>
    %c0_60 = arith.constant 0 : index
    %c0_61 = arith.constant 0 : index
    %62 = vector.load %arg8[%c0_60, %c0_61] : memref<8x128xf32, #tpu.memory_space<vmem>>, vector<8x128xf32>
    tpu.vector_store %arg8[%c0_60, %c0_61], %61 {strides = array<i32>} : memref<8x128xf32, #tpu.memory_space<vmem>>, vector<8x128xf32>,
    %63 = arith.index_cast %c3_i32 : i32 to index
    %c0_62 = arith.constant 0 : index
    %c0_63 = arith.constant 0 : index
    %64 = vector.load %arg6[%63, %c0_62, %c0_63] : memref<8x8x128xf32, #tpu.memory_space<vmem>>, vector<1x8x128xf32>
    %65 = vector.shape_cast %64 : vector<1x8x128xf32> to vector<8x128xf32>
    %66 = vector.shape_cast %61 : vector<8x128xf32> to vector<1x8x128xf32>
    tpu.vector_store %arg6[%63, %c0_62, %c0_63], %66 {strides = array<i32>} : memref<8x8x128xf32, #tpu.memory_space<vmem>>, vector<1x8x128xf32>,
    %c4_i32 = arith.constant 4 : i32
    %c0_64 = arith.constant 0 : index
    %c0_65 = arith.constant 0 : index
    %67 = vector.load %arg8[%c0_64, %c0_65] : memref<8x128xf32, #tpu.memory_space<vmem>>, vector<8x128xf32>
    %68 = arith.index_cast %c4_i32 : i32 to index
    %c0_66 = arith.constant 0 : index
    %c0_67 = arith.constant 0 : index
    %69 = vector.load %arg1[%68, %c0_66, %c0_67] : memref<8x8x16xf32, #tpu.memory_space<vmem>>, vector<1x8x16xf32>
    %70 = vector.shape_cast %69 : vector<1x8x16xf32> to vector<8x16xf32>
    %c0_68 = arith.constant 0 : index
    %c0_69 = arith.constant 0 : index
    %71 = vector.load %arg3[%c0_68, %c0_69] : memref<16x128xf32, #tpu.memory_space<vmem>>, vector<16x128xf32>
    %cst_70 = arith.constant dense<0.000000e+00> : vector<8x128xf32>
    %72 = tpu.matmul %70, %71, %cst_70 {dimension_numbers = #tpu.dot_dimension_numbers<[1], [0], [0], [1], [0, 0, 1, 1], [], []>} : vector<8x16xf32>, vector<16x128xf32>, vector<8x128xf32> -> vector<8x128xf32>
    %c0_71 = arith.constant 0 : index
    %c0_72 = arith.constant 0 : index
    %73 = vector.load %arg4[%c0_71, %c0_72] : memref<128x128xf32, #tpu.memory_space<vmem>>, vector<128x128xf32>
    %cst_73 = arith.constant dense<0.000000e+00> : vector<8x128xf32>
    %74 = tpu.matmul %67, %73, %cst_73 {dimension_numbers = #tpu.dot_dimension_numbers<[1], [0], [0], [1], [0, 0, 1, 1], [], []>} : vector<8x128xf32>, vector<128x128xf32>, vector<8x128xf32> -> vector<8x128xf32>
    %75 = arith.addf %72, %74 : vector<8x128xf32>
    %c0_74 = arith.constant 0 : index
    %c0_75 = arith.constant 0 : index
    %76 = vector.load %arg5[%c0_74, %c0_75] : memref<8x128xf32, #tpu.memory_space<vmem>>, vector<8x128xf32>
    %77 = arith.addf %75, %76 : vector<8x128xf32>
    %c0_76 = arith.constant 0 : index
    %c0_77 = arith.constant 0 : index
    %78 = vector.load %arg8[%c0_76, %c0_77] : memref<8x128xf32, #tpu.memory_space<vmem>>, vector<8x128xf32>
    tpu.vector_store %arg8[%c0_76, %c0_77], %77 {strides = array<i32>} : memref<8x128xf32, #tpu.memory_space<vmem>>, vector<8x128xf32>,
    %79 = arith.index_cast %c4_i32 : i32 to index
    %c0_78 = arith.constant 0 : index
    %c0_79 = arith.constant 0 : index
    %80 = vector.load %arg6[%79, %c0_78, %c0_79] : memref<8x8x128xf32, #tpu.memory_space<vmem>>, vector<1x8x128xf32>
    %81 = vector.shape_cast %80 : vector<1x8x128xf32> to vector<8x128xf32>
    %82 = vector.shape_cast %77 : vector<8x128xf32> to vector<1x8x128xf32>
    tpu.vector_store %arg6[%79, %c0_78, %c0_79], %82 {strides = array<i32>} : memref<8x8x128xf32, #tpu.memory_space<vmem>>, vector<1x8x128xf32>,
    %c5_i32 = arith.constant 5 : i32
    %c0_80 = arith.constant 0 : index
    %c0_81 = arith.constant 0 : index
    %83 = vector.load %arg8[%c0_80, %c0_81] : memref<8x128xf32, #tpu.memory_space<vmem>>, vector<8x128xf32>
    %84 = arith.index_cast %c5_i32 : i32 to index
    %c0_82 = arith.constant 0 : index
    %c0_83 = arith.constant 0 : index
    %85 = vector.load %arg1[%84, %c0_82, %c0_83] : memref<8x8x16xf32, #tpu.memory_space<vmem>>, vector<1x8x16xf32>
    %86 = vector.shape_cast %85 : vector<1x8x16xf32> to vector<8x16xf32>
    %c0_84 = arith.constant 0 : index
    %c0_85 = arith.constant 0 : index
    %87 = vector.load %arg3[%c0_84, %c0_85] : memref<16x128xf32, #tpu.memory_space<vmem>>, vector<16x128xf32>
    %cst_86 = arith.constant dense<0.000000e+00> : vector<8x128xf32>
    %88 = tpu.matmul %86, %87, %cst_86 {dimension_numbers = #tpu.dot_dimension_numbers<[1], [0], [0], [1], [0, 0, 1, 1], [], []>} : vector<8x16xf32>, vector<16x128xf32>, vector<8x128xf32> -> vector<8x128xf32>
    %c0_87 = arith.constant 0 : index
    %c0_88 = arith.constant 0 : index
    %89 = vector.load %arg4[%c0_87, %c0_88] : memref<128x128xf32, #tpu.memory_space<vmem>>, vector<128x128xf32>
    %cst_89 = arith.constant dense<0.000000e+00> : vector<8x128xf32>
    %90 = tpu.matmul %83, %89, %cst_89 {dimension_numbers = #tpu.dot_dimension_numbers<[1], [0], [0], [1], [0, 0, 1, 1], [], []>} : vector<8x128xf32>, vector<128x128xf32>, vector<8x128xf32> -> vector<8x128xf32>
    %91 = arith.addf %88, %90 : vector<8x128xf32>
    %c0_90 = arith.constant 0 : index
    %c0_91 = arith.constant 0 : index
    %92 = vector.load %arg5[%c0_90, %c0_91] : memref<8x128xf32, #tpu.memory_space<vmem>>, vector<8x128xf32>
    %93 = arith.addf %91, %92 : vector<8x128xf32>
    %c0_92 = arith.constant 0 : index
    %c0_93 = arith.constant 0 : index
    %94 = vector.load %arg8[%c0_92, %c0_93] : memref<8x128xf32, #tpu.memory_space<vmem>>, vector<8x128xf32>
    tpu.vector_store %arg8[%c0_92, %c0_93], %93 {strides = array<i32>} : memref<8x128xf32, #tpu.memory_space<vmem>>, vector<8x128xf32>,
    %95 = arith.index_cast %c5_i32 : i32 to index
    %c0_94 = arith.constant 0 : index
    %c0_95 = arith.constant 0 : index
    %96 = vector.load %arg6[%95, %c0_94, %c0_95] : memref<8x8x128xf32, #tpu.memory_space<vmem>>, vector<1x8x128xf32>
    %97 = vector.shape_cast %96 : vector<1x8x128xf32> to vector<8x128xf32>
    %98 = vector.shape_cast %93 : vector<8x128xf32> to vector<1x8x128xf32>
    tpu.vector_store %arg6[%95, %c0_94, %c0_95], %98 {strides = array<i32>} : memref<8x8x128xf32, #tpu.memory_space<vmem>>, vector<1x8x128xf32>,
    %c6_i32 = arith.constant 6 : i32
    %c0_96 = arith.constant 0 : index
    %c0_97 = arith.constant 0 : index
    %99 = vector.load %arg8[%c0_96, %c0_97] : memref<8x128xf32, #tpu.memory_space<vmem>>, vector<8x128xf32>
    %100 = arith.index_cast %c6_i32 : i32 to index
    %c0_98 = arith.constant 0 : index
    %c0_99 = arith.constant 0 : index
    %101 = vector.load %arg1[%100, %c0_98, %c0_99] : memref<8x8x16xf32, #tpu.memory_space<vmem>>, vector<1x8x16xf32>
    %102 = vector.shape_cast %101 : vector<1x8x16xf32> to vector<8x16xf32>
    %c0_100 = arith.constant 0 : index
    %c0_101 = arith.constant 0 : index
    %103 = vector.load %arg3[%c0_100, %c0_101] : memref<16x128xf32, #tpu.memory_space<vmem>>, vector<16x128xf32>
    %cst_102 = arith.constant dense<0.000000e+00> : vector<8x128xf32>
    %104 = tpu.matmul %102, %103, %cst_102 {dimension_numbers = #tpu.dot_dimension_numbers<[1], [0], [0], [1], [0, 0, 1, 1], [], []>} : vector<8x16xf32>, vector<16x128xf32>, vector<8x128xf32> -> vector<8x128xf32>
    %c0_103 = arith.constant 0 : index
    %c0_104 = arith.constant 0 : index
    %105 = vector.load %arg4[%c0_103, %c0_104] : memref<128x128xf32, #tpu.memory_space<vmem>>, vector<128x128xf32>
    %cst_105 = arith.constant dense<0.000000e+00> : vector<8x128xf32>
    %106 = tpu.matmul %99, %105, %cst_105 {dimension_numbers = #tpu.dot_dimension_numbers<[1], [0], [0], [1], [0, 0, 1, 1], [], []>} : vector<8x128xf32>, vector<128x128xf32>, vector<8x128xf32> -> vector<8x128xf32>
    %107 = arith.addf %104, %106 : vector<8x128xf32>
    %c0_106 = arith.constant 0 : index
    %c0_107 = arith.constant 0 : index
    %108 = vector.load %arg5[%c0_106, %c0_107] : memref<8x128xf32, #tpu.memory_space<vmem>>, vector<8x128xf32>
    %109 = arith.addf %107, %108 : vector<8x128xf32>
    %c0_108 = arith.constant 0 : index
    %c0_109 = arith.constant 0 : index
    %110 = vector.load %arg8[%c0_108, %c0_109] : memref<8x128xf32, #tpu.memory_space<vmem>>, vector<8x128xf32>
    tpu.vector_store %arg8[%c0_108, %c0_109], %109 {strides = array<i32>} : memref<8x128xf32, #tpu.memory_space<vmem>>, vector<8x128xf32>,
    %111 = arith.index_cast %c6_i32 : i32 to index
    %c0_110 = arith.constant 0 : index
    %c0_111 = arith.constant 0 : index
    %112 = vector.load %arg6[%111, %c0_110, %c0_111] : memref<8x8x128xf32, #tpu.memory_space<vmem>>, vector<1x8x128xf32>
    %113 = vector.shape_cast %112 : vector<1x8x128xf32> to vector<8x128xf32>
    %114 = vector.shape_cast %109 : vector<8x128xf32> to vector<1x8x128xf32>
    tpu.vector_store %arg6[%111, %c0_110, %c0_111], %114 {strides = array<i32>} : memref<8x8x128xf32, #tpu.memory_space<vmem>>, vector<1x8x128xf32>,
    %c7_i32 = arith.constant 7 : i32
    %c0_112 = arith.constant 0 : index
    %c0_113 = arith.constant 0 : index
    %115 = vector.load %arg8[%c0_112, %c0_113] : memref<8x128xf32, #tpu.memory_space<vmem>>, vector<8x128xf32>
    %116 = arith.index_cast %c7_i32 : i32 to index
    %c0_114 = arith.constant 0 : index
    %c0_115 = arith.constant 0 : index
    %117 = vector.load %arg1[%116, %c0_114, %c0_115] : memref<8x8x16xf32, #tpu.memory_space<vmem>>, vector<1x8x16xf32>
    %118 = vector.shape_cast %117 : vector<1x8x16xf32> to vector<8x16xf32>
    %c0_116 = arith.constant 0 : index
    %c0_117 = arith.constant 0 : index
    %119 = vector.load %arg3[%c0_116, %c0_117] : memref<16x128xf32, #tpu.memory_space<vmem>>, vector<16x128xf32>
    %cst_118 = arith.constant dense<0.000000e+00> : vector<8x128xf32>
    %120 = tpu.matmul %118, %119, %cst_118 {dimension_numbers = #tpu.dot_dimension_numbers<[1], [0], [0], [1], [0, 0, 1, 1], [], []>} : vector<8x16xf32>, vector<16x128xf32>, vector<8x128xf32> -> vector<8x128xf32>
    %c0_119 = arith.constant 0 : index
    %c0_120 = arith.constant 0 : index
    %121 = vector.load %arg4[%c0_119, %c0_120] : memref<128x128xf32, #tpu.memory_space<vmem>>, vector<128x128xf32>
    %cst_121 = arith.constant dense<0.000000e+00> : vector<8x128xf32>
    %122 = tpu.matmul %115, %121, %cst_121 {dimension_numbers = #tpu.dot_dimension_numbers<[1], [0], [0], [1], [0, 0, 1, 1], [], []>} : vector<8x128xf32>, vector<128x128xf32>, vector<8x128xf32> -> vector<8x128xf32>
    %123 = arith.addf %120, %122 : vector<8x128xf32>
    %c0_122 = arith.constant 0 : index
    %c0_123 = arith.constant 0 : index
    %124 = vector.load %arg5[%c0_122, %c0_123] : memref<8x128xf32, #tpu.memory_space<vmem>>, vector<8x128xf32>
    %125 = arith.addf %123, %124 : vector<8x128xf32>
    %c0_124 = arith.constant 0 : index
    %c0_125 = arith.constant 0 : index
    %126 = vector.load %arg8[%c0_124, %c0_125] : memref<8x128xf32, #tpu.memory_space<vmem>>, vector<8x128xf32>
    tpu.vector_store %arg8[%c0_124, %c0_125], %125 {strides = array<i32>} : memref<8x128xf32, #tpu.memory_space<vmem>>, vector<8x128xf32>,
    %127 = arith.index_cast %c7_i32 : i32 to index
    %c0_126 = arith.constant 0 : index
    %c0_127 = arith.constant 0 : index
    %128 = vector.load %arg6[%127, %c0_126, %c0_127] : memref<8x8x128xf32, #tpu.memory_space<vmem>>, vector<1x8x128xf32>
    %129 = vector.shape_cast %128 : vector<1x8x128xf32> to vector<8x128xf32>
    %130 = vector.shape_cast %125 : vector<8x128xf32> to vector<1x8x128xf32>
    tpu.vector_store %arg6[%127, %c0_126, %c0_127], %130 {strides = array<i32>} : memref<8x8x128xf32, #tpu.memory_space<vmem>>, vector<1x8x128xf32>,
    %c8_i32 = arith.constant 8 : i32
    %c0_i32_128 = arith.constant 0 : i32
    %131 = arith.cmpi eq, %arg0, %c0_i32_128 : i32
    %132 = arith.extui %131 : i1 to i32
    %c0_i32_129 = arith.constant 0 : i32
    %133 = arith.cmpi ne, %132, %c0_i32_129 : i32
    scf.if %133 {
      %c0_130 = arith.constant 0 : index
      %c0_131 = arith.constant 0 : index
      %134 = vector.load %arg8[%c0_130, %c0_131] : memref<8x128xf32, #tpu.memory_space<vmem>>, vector<8x128xf32>
      %c0_132 = arith.constant 0 : index
      %c0_133 = arith.constant 0 : index
      %135 = vector.load %arg7[%c0_132, %c0_133] : memref<8x128xf32, #tpu.memory_space<vmem>>, vector<8x128xf32>
      tpu.vector_store %arg7[%c0_132, %c0_133], %134 {strides = array<i32>} : memref<8x128xf32, #tpu.memory_space<vmem>>, vector<8x128xf32>,
    } else {
    }
    return
  }
  func.func @transform_0(%arg0: i32) -> (i32, i32, i32) {
    %c0_i32 = arith.constant 0 : i32
    %c0_i32_0 = arith.constant 0 : i32
    %c0_i32_1 = arith.constant 0 : i32
    return %arg0, %c0_i32, %c0_i32_0 : i32, i32, i32
  }
  func.func @transform_1(%arg0: i32) -> (i32, i32) {
    %c0_i32 = arith.constant 0 : i32
    %c0_i32_0 = arith.constant 0 : i32
    %c0_i32_1 = arith.constant 0 : i32
    return %c0_i32, %c0_i32_0 : i32, i32
  }
  func.func @transform_2(%arg0: i32) -> (i32, i32) {
    %c0_i32 = arith.constant 0 : i32
    %c0_i32_0 = arith.constant 0 : i32
    %c0_i32_1 = arith.constant 0 : i32
    return %c0_i32, %c0_i32_0 : i32, i32
  }
  func.func @transform_3(%arg0: i32) -> (i32, i32) {
    %c0_i32 = arith.constant 0 : i32
    %c0_i32_0 = arith.constant 0 : i32
    %c0_i32_1 = arith.constant 0 : i32
    return %c0_i32, %c0_i32_0 : i32, i32
  }
  func.func @transform_4(%arg0: i32) -> (i32, i32) {
    %c0_i32 = arith.constant 0 : i32
    %c0_i32_0 = arith.constant 0 : i32
    %c0_i32_1 = arith.constant 0 : i32
    return %c0_i32, %c0_i32_0 : i32, i32
  }
  func.func @transform_5(%arg0: i32) -> (i32, i32, i32) {
    %c0_i32 = arith.constant 0 : i32
    %c0_i32_0 = arith.constant 0 : i32
    %c0_i32_1 = arith.constant 0 : i32
    return %arg0, %c0_i32, %c0_i32_0 : i32, i32, i32
  }
  func.func @transform_6(%arg0: i32) -> (i32, i32) {
    %c0_i32 = arith.constant 0 : i32
    %c0_i32_0 = arith.constant 0 : i32
    %c0_i32_1 = arith.constant 0 : i32
    return %c0_i32, %c0_i32_0 : i32, i32
  }
}

</mosaic_0001>

<bundles_post_ra>
// kernel: tpu_custom_call.1
= control target key start
LH: loop header
LB: loop body
LE: loop exit
PB: predicated region body
PF: predicated region fallthrough
CT: control target
= control target key end

     0   :  { %12 = vsyncpa [#allocation4], 0  ;;  %s2601_s0 = inlined_call_operand.hbm [shape: f32[8,8,16], index: 0, kind: input, shape index: {}]   ;;  %s2602_s1 = inlined_call_operand.hbm [shape: f32[8,128], index: 1, kind: input, shape index: {}]   ;;  %s2603_s2 = inlined_call_operand.hbm [shape: f32[16,128], index: 2, kind: input, shape index: {}]   ;;  %s2604_s3 = inlined_call_operand.hbm [shape: f32[128,128], index: 3, kind: input, shape index: {}]   ;;  %s2605_s4 = inlined_call_operand.hbm [shape: f32[8,128], index: 4, kind: input, shape index: {}]   ;;  %s2606_s5 = inlined_call_operand.hbm [shape: f32[8,8,128], index: 5, kind: output, shape index: {0}]   ;;  %s2607_s6 = inlined_call_operand.hbm [shape: f32[8,128], index: 6, kind: output, shape index: {1}]  }
   0x1   :  { %13 = vsyncpa [#allocation7], 0 }
   0x2   :  { %14 = vsyncpa [#allocation10], 0 }
   0x3   :  { %15 = vsyncpa [#allocation5], 0 }
   0x4   :  { %16 = vsyncpa [#allocation14], 0  ;;  %s2148_s21 = smov [#allocation6]  }
   0x5   :  { %s35_s22 = sshll.u32 %s2148_s21, 4  ;;  %s36_s22 = int_to_ptr.vmem [resolvable:$true] %s35_s22 }
   0x6   :  { %s2006_s23 = scalar_lea.vmem %s36_s22, 128  ;;  %p2011_p1 = scmp.lt.s32.totalorder %s36_s22, %s36_s22 }
   0x7   :  { %p2007_p0 = scmp.ne.s32.totalorder %s36_s22, %s2006_s23  ;;  %p2012_p2 = scmp.lt.s32.totalorder %s2006_s23, %s2006_s23 }
   0x9   :  { %p2013_p3 = por %p2012_p2, %p2011_p1 }
   0xb   :  { %p2014_p4 = pnand %p2013_p3, %p2007_p0 }
   0xd   :  { %2017 = shalt.err (!%p2014_p4)
}
   0xe   :  { %38 = dma.hbm_to_vmem [thread:$0]  %s2602_s1, 128, %s36_s22, [#allocation7]  }
   0xf   :  { %s2149_s26 = smov [#allocation9]   ;;  %s2150_s28 = smov [#allocation3]  }
  0x10   :  { %s56_s27 = sshll.u32 %s2149_s26, 4  ;;  %s22_s29 = sshll.u32 %s2150_s28, 4  ;;  %s57_s27 = int_to_ptr.vmem [resolvable:$true] %s56_s27  ;;  %s23_s29 = int_to_ptr.vmem [resolvable:$true] %s22_s29 }
  0x11   :  { %s2026_s30 = scalar_lea.vmem %s57_s27, 2048  ;;  %p2031_p6 = scmp.lt.s32.totalorder %s57_s27, %s57_s27 }
  0x12   :  { %p2027_p5 = scmp.ne.s32.totalorder %s57_s27, %s2026_s30  ;;  %p2032_p7 = scmp.lt.s32.totalorder %s2026_s30, %s2026_s30 }
  0x14   :  { %p2033_p8 = por %p2032_p7, %p2031_p6 }
  0x16   :  { %p2034_p9 = pnand %p2033_p8, %p2027_p5 }
  0x18   :  { %2037 = shalt.err (!%p2034_p9)
}
  0x19   :  { %s2151_s7 = smov 128   ;;  %s2152_s8 = smov 8  }
  0x1a   :  { %62 = dma.hbm_to_vmem [thread:$0]  %s2604_s3, 2048, %s57_s27, [#allocation10], %s2151_s7, %s2151_s7, %s2152_s8  }
  0x1b   :  { %s2046_s1 = scalar_lea.vmem %s23_s29, 1024  ;;  %p2051_p11 = scmp.lt.s32.totalorder %s23_s29, %s23_s29 }
  0x1c   :  { %p2047_p10 = scmp.ne.s32.totalorder %s23_s29, %s2046_s1  ;;  %p2052_p12 = scmp.lt.s32.totalorder %s2046_s1, %s2046_s1 }
  0x1e   :  { %p2053_p13 = por %p2052_p12, %p2051_p11 }
  0x20   :  { %p2054_p0 = pnand %p2053_p13, %p2047_p10 }
  0x22   :  { %2057 = shalt.err (!%p2054_p0)
}
  0x23   :  { %28 = dma.hbm_to_vmem [thread:$0]  %s2601_s0, 1024, %s23_s29, [#allocation4], %s2151_s7, %s2151_s7, %s2152_s8  }
  0x24   :  { %s2153_s13 = smov [#allocation8]   ;;  %s2154_s15 = smov [#allocation11]  }
  0x25   :  { %s44_s14 = sshll.u32 %s2153_s13, 4  ;;  %s69_s3 = sshll.u32 %s2154_s15, 4  ;;  %s45_s14 = int_to_ptr.vmem [resolvable:$true] %s44_s14  ;;  %s70_s3 = int_to_ptr.vmem [resolvable:$true] %s69_s3 }
  0x26   :  { %s2066_s16 = scalar_lea.vmem %s45_s14, 256  ;;  %p2071_p2 = scmp.lt.s32.totalorder %s45_s14, %s45_s14 }
  0x27   :  { %p2067_p1 = scmp.ne.s32.totalorder %s45_s14, %s2066_s16  ;;  %p2072_p3 = scmp.lt.s32.totalorder %s2066_s16, %s2066_s16 }
  0x29   :  { %p2073_p4 = por %p2072_p3, %p2071_p2 }
  0x2b   :  { %p2074_p5 = pnand %p2073_p4, %p2067_p1 }
  0x2d   :  { %2077 = shalt.err (!%p2074_p5)
}
  0x2e   :  { %50 = dma.hbm_to_vmem [thread:$0]  %s2603_s2, 256, %s45_s14, [#allocation7], %s2151_s7, %s2151_s7, %s2152_s8  }
  0x2f   :  { %s2086_s0 = scalar_lea.vmem %s70_s3, 128  ;;  %p2091_p7 = scmp.lt.s32.totalorder %s70_s3, %s70_s3 }
  0x30   :  { %p2087_p6 = scmp.ne.s32.totalorder %s70_s3, %s2086_s0  ;;  %p2092_p8 = scmp.lt.s32.totalorder %s2086_s0, %s2086_s0 }
  0x32   :  { %p2093_p9 = por %p2092_p8, %p2091_p7 }
  0x34   :  { %p2094_p10 = pnand %p2093_p9, %p2087_p6 }
  0x36   :  { %2097 = shalt.err (!%p2094_p10)
}
  0x37   :  { %72 = dma.hbm_to_vmem [thread:$0]  %s2605_s4, 128, %s70_s3, [#allocation10]  }
  0x38   :  { %2138 = dma.done.wait [#allocation4], 1024  }
  0x39   :  { %2139 = vsyncadd [#allocation4], 4294966272 }
  0x3a   :  { %2140 = dma.done.wait [#allocation7], 384  }
  0x3b   :  { %2141 = vsyncadd [#allocation7], 4294966912 }
  0x3c   :  { %2142 = dma.done.wait [#allocation10], 2176  }
  0x3d   :  { %2143 = vsyncadd [#allocation10], 4294965120  ;;  %v2155_v0 = vmov 0.0   ;;  %vm2156_vm0 = vmmov 0   ;;  %v2224_v1 = vld [vmem:[#allocation9 + $0x78] sm:$0xff]  ;;  %v2226_v2 = vld [vmem:[#allocation9 + $0x70] sm:$0xff] }
  0x3e   :  { %1651 = vmatprep.subr.mxu0 %v2155_v0  ;;  %1686 = vmatprep.subr.mxu1 %v2155_v0  ;;  %v2230_v3 = vld [vmem:[#allocation9 + $0x68] sm:$0xff]  ;;  %v2234_v4 = vld [vmem:[#allocation9 + $0x60] sm:$0xff]  ;;  %v2236_v5 = vld [vmem:[#allocation8 + $0x8] sm:$0xff]  ;;  %vm184_vm1 = vcmask 130048   ;;  %s2157_s2 = smov [#allocation12]   ;;  %s2158_s21 = smov [#allocation13]  }
  0x3f   :  { %1690 = vmatprep.mubr.msk.f32.mxu1 %vm2156_vm0, %v2155_v0  ;;  %1683 = vmatprep.mubr.msk.f32.mxu0 %vm2156_vm0, %v2155_v0  ;;  %v2240_v6 = vld [vmem:[#allocation8] sm:$0xff]  ;;  %v95_v7 = vld [vmem:[#allocation3] sm:$0xff]  ;;  %v2243_v8 = vld [vmem:[#allocation9 + $0x58] sm:$0xff]  ;;  %s1455_s4 = sshll.u32 %s2157_s2, 4  ;;  %s1468_s22 = sshll.u32 %s2158_s21, 4  ;;  %s1456_s4 = int_to_ptr.vmem [resolvable:$true] %s1455_s4  ;;  %s1469_s22 = int_to_ptr.vmem [resolvable:$true] %s1468_s22 }
  0x40   :  { %1652 = vmatpush3.msra.mxu0 %v2224_v1  ;;  %1687 = vmatpush3.msra.mxu1 %v2236_v5  ;;  %v2249_v9 = vld [vmem:[#allocation9 + $0x50] sm:$0xff]  ;;  %v2255_v10 = vld [vmem:[#allocation9 + $0x48] sm:$0xff]  ;;  %v2261_v11 = vld [vmem:[#allocation9 + $0x40] sm:$0xff]  ;;  %s2098_s23 = scalar_lea.vmem %s1456_s4, 1024  ;;  %p2103_p12 = scmp.lt.s32.totalorder %s1456_s4, %s1456_s4 }
  0x41   :  { %1653 = vmatprep.subr.mxu0 %v2155_v0  ;;  %1688 = vmatprep.subr.mxu1 %v2155_v0  ;;  %v2267_v12 = vld [vmem:[#allocation9 + $0x38] sm:$0xff]  ;;  %v2273_v13 = vld [vmem:[#allocation9 + $0x30] sm:$0xff]  ;;  %v2279_v14 = vld [vmem:[#allocation9 + $0x28] sm:$0xff]  ;;  %p2099_p11 = scmp.ne.s32.totalorder %s1456_s4, %s2098_s23  ;;  %p2104_p13 = scmp.lt.s32.totalorder %s2098_s23, %s2098_s23 }
  0x42   :  { %1654 = vmatpush3.msra.mxu0 %v2226_v2  ;;  %1689 = vmatpush3.msra.mxu1 %v2240_v6  ;;  %v2285_v15 = vld [vmem:[#allocation9 + $0x20] sm:$0xff]  ;;  %v2291_v16 = vld [vmem:[#allocation9 + $0x18] sm:$0xff]  ;;  %v2297_v17 = vld [vmem:[#allocation9 + $0x10] sm:$0xff] }
  0x43   :  { %1655 = vmatprep.subr.mxu0 %v2155_v0  ;;  %1691 = vmatmul.mubr.msk.f32.vlgmr.msra.gmra.mxu1 %vm184_vm1, %v95_v7  ;;  %v2303_v18 = vld [vmem:[#allocation9 + $0x8] sm:$0xff]  ;;  %v2309_v19 = vld [vmem:[#allocation9] sm:$0xff]  ;;  %v264_v21 = vld [vmem:[#allocation3 + $0x8] sm:$0xff]  ;;  %p2105_p0 = por %p2104_p13, %p2103_p12 }
  0x44   :  { %1656 = vmatpush3.msra.mxu0 %v2230_v3  ;;  %1693 = vmatprep.subr.mxu1 %v2155_v0  ;;  %v92_v20 = vld [vmem:[#allocation6] sm:$0xff]  ;;  %v2372_v25 = vld [vmem:[#allocation11] sm:$0xff]  ;;  %v433_v31 = vld [vmem:[#allocation3 + $0x10] sm:$0xff] }
  0x45   :  { %1657 = vmatprep.subr.mxu0 %v2155_v0  ;;  %1694 = vmatpush3.msra.mxu1 %v2224_v1  ;;  %v602_v38 = vld [vmem:[#allocation3 + $0x18] sm:$0xff]  ;;  %v771_v45 = vld [vmem:[#allocation3 + $0x20] sm:$0xff]  ;;  %v940_v52 = vld [vmem:[#allocation3 + $0x28] sm:$0xff]  ;;  %p2106_p1 = pnand %p2105_p0, %p2099_p11 }
  0x46   :  { %1658 = vmatpush3.msra.mxu0 %v2234_v4  ;;  %1695 = vmatprep.subr.mxu1 %v2155_v0  ;;  %v1109_v59 = vld [vmem:[#allocation3 + $0x30] sm:$0xff] }
  0x47   :  { %1659 = vmatprep.subr.mxu0 %v2155_v0  ;;  %1696 = vmatpush3.msra.mxu1 %v2226_v2 }
  0x48   :  { %1660 = vmatpush3.msra.mxu0 %v2243_v8  ;;  %1697 = vmatprep.subr.mxu1 %v2155_v0 }
  0x49   :  { %1661 = vmatprep.subr.mxu0 %v2155_v0  ;;  %1698 = vmatpush3.msra.mxu1 %v2230_v3 }
  0x4a   :  { %1662 = vmatpush3.msra.mxu0 %v2249_v9  ;;  %1699 = vmatprep.subr.mxu1 %v2155_v0 }
  0x4b   :  { %1663 = vmatprep.subr.mxu0 %v2155_v0  ;;  %1700 = vmatpush3.msra.mxu1 %v2234_v4 }
  0x4c   :  { %1664 = vmatpush3.msra.mxu0 %v2255_v10  ;;  %1701 = vmatprep.subr.mxu1 %v2155_v0 }
  0x4d   :  { %1665 = vmatprep.subr.mxu0 %v2155_v0  ;;  %1702 = vmatpush3.msra.mxu1 %v2243_v8 }
  0x4e   :  { %1666 = vmatpush3.msra.mxu0 %v2261_v11  ;;  %1703 = vmatprep.subr.mxu1 %v2155_v0 }
  0x4f   :  { %1667 = vmatprep.subr.mxu0 %v2155_v0  ;;  %1704 = vmatpush3.msra.mxu1 %v2249_v9 }
  0x50   :  { %1668 = vmatpush3.msra.mxu0 %v2267_v12  ;;  %1705 = vmatprep.subr.mxu1 %v2155_v0 }
  0x51   :  { %1669 = vmatprep.subr.mxu0 %v2155_v0  ;;  %1706 = vmatpush3.msra.mxu1 %v2255_v10 }
  0x52   :  { %1670 = vmatpush3.msra.mxu0 %v2273_v13  ;;  %1707 = vmatprep.subr.mxu1 %v2155_v0 }
  0x53   :  { %1671 = vmatprep.subr.mxu0 %v2155_v0  ;;  %1708 = vmatpush3.msra.mxu1 %v2261_v11 }
  0x54   :  { %1672 = vmatpush3.msra.mxu0 %v2279_v14  ;;  %1709 = vmatprep.subr.mxu1 %v2155_v0 }
  0x55   :  { %1673 = vmatprep.subr.mxu0 %v2155_v0  ;;  %1710 = vmatpush3.msra.mxu1 %v2267_v12 }
  0x56   :  { %1674 = vmatpush3.msra.mxu0 %v2285_v15  ;;  %1711 = vmatprep.subr.mxu1 %v2155_v0 }
  0x57   :  { %1675 = vmatprep.subr.mxu0 %v2155_v0  ;;  %1712 = vmatpush3.msra.mxu1 %v2273_v13 }
  0x58   :  { %1676 = vmatpush3.msra.mxu0 %v2291_v16  ;;  %1713 = vmatprep.subr.mxu1 %v2155_v0 }
  0x59   :  { %1677 = vmatprep.subr.mxu0 %v2155_v0  ;;  %1714 = vmatpush3.msra.mxu1 %v2279_v14 }
  0x5a   :  { %1678 = vmatpush3.msra.mxu0 %v2297_v17  ;;  %1715 = vmatprep.subr.mxu1 %v2155_v0 }
  0x5b   :  { %1679 = vmatprep.subr.mxu0 %v2155_v0  ;;  %1716 = vmatpush3.msra.mxu1 %v2285_v15 }
  0x5c   :  { %1680 = vmatpush3.msra.mxu0 %v2303_v18  ;;  %1717 = vmatprep.subr.mxu1 %v2155_v0 }
  0x5d   :  { %1681 = vmatprep.subr.mxu0 %v2155_v0  ;;  %1718 = vmatpush3.msra.mxu1 %v2291_v16 }
  0x5e   :  { %1682 = vmatpush3.msra.mxu0 %v2309_v19  ;;  %1719 = vmatprep.subr.mxu1 %v2155_v0 }
  0x5f   :  { %1684 = vmatmul.mubr.f32.vlgmr.msra.gmra.mxu0 %v92_v20  ;;  %1728 = vmatprep.subr.mxu0 %v2155_v0 }
  0x60   :  { %1729 = vmatpush3.msra.mxu0 %v2236_v5  ;;  %1720 = vmatpush3.msra.mxu1 %v2297_v17 }
  0x61   :  { %1730 = vmatprep.subr.mxu0 %v2155_v0  ;;  %1721 = vmatprep.subr.mxu1 %v2155_v0 }
  0x62   :  { %1731 = vmatpush3.msra.mxu0 %v2240_v6  ;;  %1732 = vmatprep.mubr.msk.f32.mxu0 %vm2156_vm0, %v2155_v0 }
  0x63   :  { %1722 = vmatpush3.msra.mxu1 %v2303_v18  ;;  %1725 = vmatprep.mubr.msk.f32.mxu1 %vm2156_vm0, %v2155_v0 }
  0x64   :  { %1723 = vmatprep.subr.mxu1 %v2155_v0  ;;  %1735 = vmatprep.subr.mxu0 %v2155_v0 }
  0x65   :  { %1724 = vmatpush3.msra.mxu1 %v2309_v19  ;;  %1733 = vmatmul.mubr.msk.f32.vlgmr.msra.gmra.mxu0 %vm184_vm1, %v264_v21 }
  0x66   :  { %1770 = vmatprep.subr.mxu1 %v2155_v0  ;;  %1736 = vmatpush3.msra.mxu0 %v2224_v1 }
  0x67   :  { %1767 = vmatprep.mubr.msk.f32.mxu0 %vm2156_vm0, %v2155_v0  ;;  %1737 = vmatprep.subr.mxu0 %v2155_v0 }
  0x68   :  { %1738 = vmatpush3.msra.mxu0 %v2226_v2 }
  0x69   :  { %1739 = vmatprep.subr.mxu0 %v2155_v0 }
  0x6a   :  { %1740 = vmatpush3.msra.mxu0 %v2230_v3 }
  0x6b   :  { %1741 = vmatprep.subr.mxu0 %v2155_v0 }
  0x6c   :  { %1742 = vmatpush3.msra.mxu0 %v2234_v4 }
  0x6d   :  { %1743 = vmatprep.subr.mxu0 %v2155_v0 }
  0x6e   :  { %1744 = vmatpush3.msra.mxu0 %v2243_v8 }
  0x6f   :  { %1745 = vmatprep.subr.mxu0 %v2155_v0 }
  0x70   :  { %1746 = vmatpush3.msra.mxu0 %v2249_v9 }
  0x71   :  { %1747 = vmatprep.subr.mxu0 %v2155_v0 }
  0x72   :  { %1748 = vmatpush3.msra.mxu0 %v2255_v10 }
  0x73   :  { %1749 = vmatprep.subr.mxu0 %v2155_v0 }
  0x74   :  { %1750 = vmatpush3.msra.mxu0 %v2261_v11 }
  0x75   :  { %1751 = vmatprep.subr.mxu0 %v2155_v0 }
  0x76   :  { %1752 = vmatpush3.msra.mxu0 %v2267_v12 }
  0x77   :  { %1753 = vmatprep.subr.mxu0 %v2155_v0 }
  0x78   :  { %1754 = vmatpush3.msra.mxu0 %v2273_v13 }
  0x79   :  { %1755 = vmatprep.subr.mxu0 %v2155_v0 }
  0x7a   :  { %1756 = vmatpush3.msra.mxu0 %v2279_v14 }
  0x7b   :  { %1757 = vmatprep.subr.mxu0 %v2155_v0 }
  0x7c   :  { %1758 = vmatpush3.msra.mxu0 %v2285_v15 }
  0x7d   :  { %1759 = vmatprep.subr.mxu0 %v2155_v0 }
  0x7e   :  { %1760 = vmatpush3.msra.mxu0 %v2291_v16 }
  0x7f   :  { %1761 = vmatprep.subr.mxu0 %v2155_v0 }
  0x80   :  { %1762 = vmatpush3.msra.mxu0 %v2297_v17 }
  0x81   :  { %1763 = vmatprep.subr.mxu0 %v2155_v0 }
  0x82   :  { %1764 = vmatpush3.msra.mxu0 %v2303_v18 }
  0x83   :  { %1765 = vmatprep.subr.mxu0 %v2155_v0 }
  0x84   :  { %1766 = vmatpush3.msra.mxu0 %v2309_v19 }
  0x85   :  { %1812 = vmatprep.subr.mxu0 %v2155_v0 }
 0x103   :  { %v254_v22 = vpop.f32.mrf.mxu1 }
 0x105   :  { %v1692_v23 = vpop.f32.mrf.mxu1 }
 0x11f   :  { %v180_v24 = vpop.f32.mrf.mxu0 }
 0x120   :  { %v255_v26 = vadd.f32 %v254_v22, %v180_v24 }
 0x121   :  { %v1685_v27 = vpop.f32.mrf.mxu0 }
 0x122   :  { %v259_v28 = vadd.f32 %v2372_v25, %v255_v26 }
 0x124   :  { %261 = vst [vmem:[#allocation12] sm:$0xff] %v259_v28  ;;  %1726 = vmatmul.mubr.f32.vlgmr.msra.gmra.mxu1 %v259_v28 }
 0x125   :  { %1771 = vmatpush3.msra.mxu1 %v2236_v5  ;;  %1774 = vmatprep.mubr.msk.f32.mxu1 %vm2156_vm0, %v2155_v0  ;;  %v422_v29 = vpop.f32.mrf.mxu0 }
 0x126   :  { %1772 = vmatprep.subr.mxu1 %v2155_v0 }
 0x127   :  { %1773 = vmatpush3.msra.mxu1 %v2240_v6  ;;  %v1734_v30 = vpop.f32.mrf.mxu0 }
 0x128   :  { %1777 = vmatprep.subr.mxu1 %v2155_v0  ;;  %1775 = vmatmul.mubr.msk.f32.vlgmr.msra.gmra.mxu1 %vm184_vm1, %v433_v31 }
 0x129   :  { %1778 = vmatpush3.msra.mxu1 %v2224_v1  ;;  %1809 = vmatprep.mubr.msk.f32.mxu1 %vm2156_vm0, %v2155_v0 }
 0x12a   :  { %1779 = vmatprep.subr.mxu1 %v2155_v0 }
 0x12b   :  { %1780 = vmatpush3.msra.mxu1 %v2226_v2 }
 0x12c   :  { %1781 = vmatprep.subr.mxu1 %v2155_v0 }
 0x12d   :  { %1782 = vmatpush3.msra.mxu1 %v2230_v3 }
 0x12e   :  { %1783 = vmatprep.subr.mxu1 %v2155_v0 }
 0x12f   :  { %1784 = vmatpush3.msra.mxu1 %v2234_v4 }
 0x130   :  { %1785 = vmatprep.subr.mxu1 %v2155_v0 }
 0x131   :  { %1786 = vmatpush3.msra.mxu1 %v2243_v8 }
 0x132   :  { %1787 = vmatprep.subr.mxu1 %v2155_v0 }
 0x133   :  { %1788 = vmatpush3.msra.mxu1 %v2249_v9 }
 0x134   :  { %1789 = vmatprep.subr.mxu1 %v2155_v0 }
 0x135   :  { %1790 = vmatpush3.msra.mxu1 %v2255_v10 }
 0x136   :  { %1791 = vmatprep.subr.mxu1 %v2155_v0 }
 0x137   :  { %1792 = vmatpush3.msra.mxu1 %v2261_v11 }
 0x138   :  { %1793 = vmatprep.subr.mxu1 %v2155_v0 }
 0x139   :  { %1794 = vmatpush3.msra.mxu1 %v2267_v12 }
 0x13a   :  { %1795 = vmatprep.subr.mxu1 %v2155_v0 }
 0x13b   :  { %1796 = vmatpush3.msra.mxu1 %v2273_v13 }
 0x13c   :  { %1797 = vmatprep.subr.mxu1 %v2155_v0 }
 0x13d   :  { %1798 = vmatpush3.msra.mxu1 %v2279_v14 }
 0x13e   :  { %1799 = vmatprep.subr.mxu1 %v2155_v0 }
 0x13f   :  { %1800 = vmatpush3.msra.mxu1 %v2285_v15 }
 0x140   :  { %1801 = vmatprep.subr.mxu1 %v2155_v0 }
 0x141   :  { %1802 = vmatpush3.msra.mxu1 %v2291_v16 }
 0x142   :  { %1803 = vmatprep.subr.mxu1 %v2155_v0 }
 0x143   :  { %1804 = vmatpush3.msra.mxu1 %v2297_v17 }
 0x144   :  { %1805 = vmatprep.subr.mxu1 %v2155_v0 }
 0x145   :  { %1806 = vmatpush3.msra.mxu1 %v2303_v18 }
 0x146   :  { %1807 = vmatprep.subr.mxu1 %v2155_v0 }
 0x147   :  { %1808 = vmatpush3.msra.mxu1 %v2309_v19 }
 0x148   :  { %1854 = vmatprep.subr.mxu1 %v2155_v0 }
 0x1e4   :  { %v349_v32 = vpop.f32.mrf.mxu1 }
 0x1e5   :  { %v423_v33 = vadd.f32 %v422_v29, %v349_v32 }
 0x1e6   :  { %v1727_v34 = vpop.f32.mrf.mxu1 }
 0x1e7   :  { %v427_v35 = vadd.f32 %v423_v33, %v2372_v25 }
 0x1e8   :  { %v591_v36 = vpop.f32.mrf.mxu1 }
 0x1e9   :  { %430 = vst [vmem:[#allocation12 + $0x8] sm:$0xff] %v427_v35  ;;  %1768 = vmatmul.mubr.f32.vlgmr.msra.gmra.mxu0 %v427_v35 }
 0x1ea   :  { %1813 = vmatpush3.msra.mxu0 %v2236_v5  ;;  %1816 = vmatprep.mubr.msk.f32.mxu0 %vm2156_vm0, %v2155_v0  ;;  %v1776_v37 = vpop.f32.mrf.mxu1 }
 0x1eb   :  { %1814 = vmatprep.subr.mxu0 %v2155_v0 }
 0x1ec   :  { %1815 = vmatpush3.msra.mxu0 %v2240_v6 }
 0x1ed   :  { %1819 = vmatprep.subr.mxu0 %v2155_v0  ;;  %1817 = vmatmul.mubr.msk.f32.vlgmr.msra.gmra.mxu0 %vm184_vm1, %v602_v38 }
 0x1ee   :  { %1820 = vmatpush3.msra.mxu0 %v2224_v1  ;;  %1851 = vmatprep.mubr.msk.f32.mxu0 %vm2156_vm0, %v2155_v0 }
 0x1ef   :  { %1821 = vmatprep.subr.mxu0 %v2155_v0 }
 0x1f0   :  { %1822 = vmatpush3.msra.mxu0 %v2226_v2 }
 0x1f1   :  { %1823 = vmatprep.subr.mxu0 %v2155_v0 }
 0x1f2   :  { %1824 = vmatpush3.msra.mxu0 %v2230_v3 }
 0x1f3   :  { %1825 = vmatprep.subr.mxu0 %v2155_v0 }
 0x1f4   :  { %1826 = vmatpush3.msra.mxu0 %v2234_v4 }
 0x1f5   :  { %1827 = vmatprep.subr.mxu0 %v2155_v0 }
 0x1f6   :  { %1828 = vmatpush3.msra.mxu0 %v2243_v8 }
 0x1f7   :  { %1829 = vmatprep.subr.mxu0 %v2155_v0 }
 0x1f8   :  { %1830 = vmatpush3.msra.mxu0 %v2249_v9 }
 0x1f9   :  { %1831 = vmatprep.subr.mxu0 %v2155_v0 }
 0x1fa   :  { %1832 = vmatpush3.msra.mxu0 %v2255_v10 }
 0x1fb   :  { %1833 = vmatprep.subr.mxu0 %v2155_v0 }
 0x1fc   :  { %1834 = vmatpush3.msra.mxu0 %v2261_v11 }
 0x1fd   :  { %1835 = vmatprep.subr.mxu0 %v2155_v0 }
 0x1fe   :  { %1836 = vmatpush3.msra.mxu0 %v2267_v12 }
 0x1ff   :  { %1837 = vmatprep.subr.mxu0 %v2155_v0 }
 0x200   :  { %1838 = vmatpush3.msra.mxu0 %v2273_v13 }
 0x201   :  { %1839 = vmatprep.subr.mxu0 %v2155_v0 }
 0x202   :  { %1840 = vmatpush3.msra.mxu0 %v2279_v14 }
 0x203   :  { %1841 = vmatprep.subr.mxu0 %v2155_v0 }
 0x204   :  { %1842 = vmatpush3.msra.mxu0 %v2285_v15 }
 0x205   :  { %1843 = vmatprep.subr.mxu0 %v2155_v0 }
 0x206   :  { %1844 = vmatpush3.msra.mxu0 %v2291_v16 }
 0x207   :  { %1845 = vmatprep.subr.mxu0 %v2155_v0 }
 0x208   :  { %1846 = vmatpush3.msra.mxu0 %v2297_v17 }
 0x209   :  { %1847 = vmatprep.subr.mxu0 %v2155_v0 }
 0x20a   :  { %1848 = vmatpush3.msra.mxu0 %v2303_v18 }
 0x20b   :  { %1849 = vmatprep.subr.mxu0 %v2155_v0 }
 0x20c   :  { %1850 = vmatpush3.msra.mxu0 %v2309_v19 }
 0x20d   :  { %1896 = vmatprep.subr.mxu0 %v2155_v0 }
 0x2a9   :  { %v518_v39 = vpop.f32.mrf.mxu0 }
 0x2aa   :  { %v592_v40 = vadd.f32 %v591_v36, %v518_v39 }
 0x2ab   :  { %v1769_v41 = vpop.f32.mrf.mxu0 }
 0x2ac   :  { %v596_v42 = vadd.f32 %v592_v40, %v2372_v25 }
 0x2ad   :  { %v760_v43 = vpop.f32.mrf.mxu0 }
 0x2ae   :  { %599 = vst [vmem:[#allocation12 + $0x10] sm:$0xff] %v596_v42  ;;  %1810 = vmatmul.mubr.f32.vlgmr.msra.gmra.mxu1 %v596_v42 }
 0x2af   :  { %1855 = vmatpush3.msra.mxu1 %v2236_v5  ;;  %1858 = vmatprep.mubr.msk.f32.mxu1 %vm2156_vm0, %v2155_v0  ;;  %v1818_v44 = vpop.f32.mrf.mxu0 }
 0x2b0   :  { %1856 = vmatprep.subr.mxu1 %v2155_v0 }
 0x2b1   :  { %1857 = vmatpush3.msra.mxu1 %v2240_v6 }
 0x2b2   :  { %1861 = vmatprep.subr.mxu1 %v2155_v0  ;;  %1859 = vmatmul.mubr.msk.f32.vlgmr.msra.gmra.mxu1 %vm184_vm1, %v771_v45 }
 0x2b3   :  { %1862 = vmatpush3.msra.mxu1 %v2224_v1  ;;  %1893 = vmatprep.mubr.msk.f32.mxu1 %vm2156_vm0, %v2155_v0 }
 0x2b4   :  { %1863 = vmatprep.subr.mxu1 %v2155_v0 }
 0x2b5   :  { %1864 = vmatpush3.msra.mxu1 %v2226_v2 }
 0x2b6   :  { %1865 = vmatprep.subr.mxu1 %v2155_v0 }
 0x2b7   :  { %1866 = vmatpush3.msra.mxu1 %v2230_v3 }
 0x2b8   :  { %1867 = vmatprep.subr.mxu1 %v2155_v0 }
 0x2b9   :  { %1868 = vmatpush3.msra.mxu1 %v2234_v4 }
 0x2ba   :  { %1869 = vmatprep.subr.mxu1 %v2155_v0 }
 0x2bb   :  { %1870 = vmatpush3.msra.mxu1 %v2243_v8 }
 0x2bc   :  { %1871 = vmatprep.subr.mxu1 %v2155_v0 }
 0x2bd   :  { %1872 = vmatpush3.msra.mxu1 %v2249_v9 }
 0x2be   :  { %1873 = vmatprep.subr.mxu1 %v2155_v0 }
 0x2bf   :  { %1874 = vmatpush3.msra.mxu1 %v2255_v10 }
 0x2c0   :  { %1875 = vmatprep.subr.mxu1 %v2155_v0 }
 0x2c1   :  { %1876 = vmatpush3.msra.mxu1 %v2261_v11 }
 0x2c2   :  { %1877 = vmatprep.subr.mxu1 %v2155_v0 }
 0x2c3   :  { %1878 = vmatpush3.msra.mxu1 %v2267_v12 }
 0x2c4   :  { %1879 = vmatprep.subr.mxu1 %v2155_v0 }
 0x2c5   :  { %1880 = vmatpush3.msra.mxu1 %v2273_v13 }
 0x2c6   :  { %1881 = vmatprep.subr.mxu1 %v2155_v0 }
 0x2c7   :  { %1882 = vmatpush3.msra.mxu1 %v2279_v14 }
 0x2c8   :  { %1883 = vmatprep.subr.mxu1 %v2155_v0 }
 0x2c9   :  { %1884 = vmatpush3.msra.mxu1 %v2285_v15 }
 0x2ca   :  { %1885 = vmatprep.subr.mxu1 %v2155_v0 }
 0x2cb   :  { %1886 = vmatpush3.msra.mxu1 %v2291_v16 }
 0x2cc   :  { %1887 = vmatprep.subr.mxu1 %v2155_v0 }
 0x2cd   :  { %1888 = vmatpush3.msra.mxu1 %v2297_v17 }
 0x2ce   :  { %1889 = vmatprep.subr.mxu1 %v2155_v0 }
 0x2cf   :  { %1890 = vmatpush3.msra.mxu1 %v2303_v18 }
 0x2d0   :  { %1891 = vmatprep.subr.mxu1 %v2155_v0 }
 0x2d1   :  { %1892 = vmatpush3.msra.mxu1 %v2309_v19 }
 0x2d2   :  { %1938 = vmatprep.subr.mxu1 %v2155_v0 }
 0x36e   :  { %v687_v46 = vpop.f32.mrf.mxu1 }
 0x36f   :  { %v761_v47 = vadd.f32 %v760_v43, %v687_v46 }
 0x370   :  { %v1811_v48 = vpop.f32.mrf.mxu1 }
 0x371   :  { %v765_v49 = vadd.f32 %v761_v47, %v2372_v25 }
 0x372   :  { %v929_v50 = vpop.f32.mrf.mxu1 }
 0x373   :  { %768 = vst [vmem:[#allocation12 + $0x18] sm:$0xff] %v765_v49  ;;  %1852 = vmatmul.mubr.f32.vlgmr.msra.gmra.mxu0 %v765_v49 }
 0x374   :  { %1897 = vmatpush3.msra.mxu0 %v2236_v5  ;;  %1900 = vmatprep.mubr.msk.f32.mxu0 %vm2156_vm0, %v2155_v0  ;;  %v1860_v51 = vpop.f32.mrf.mxu1 }
 0x375   :  { %1898 = vmatprep.subr.mxu0 %v2155_v0 }
 0x376   :  { %1899 = vmatpush3.msra.mxu0 %v2240_v6 }
 0x377   :  { %1903 = vmatprep.subr.mxu0 %v2155_v0  ;;  %1901 = vmatmul.mubr.msk.f32.vlgmr.msra.gmra.mxu0 %vm184_vm1, %v940_v52 }
 0x378   :  { %1904 = vmatpush3.msra.mxu0 %v2224_v1  ;;  %1935 = vmatprep.mubr.msk.f32.mxu0 %vm2156_vm0, %v2155_v0 }
 0x379   :  { %1905 = vmatprep.subr.mxu0 %v2155_v0 }
 0x37a   :  { %1906 = vmatpush3.msra.mxu0 %v2226_v2 }
 0x37b   :  { %1907 = vmatprep.subr.mxu0 %v2155_v0 }
 0x37c   :  { %1908 = vmatpush3.msra.mxu0 %v2230_v3 }
 0x37d   :  { %1909 = vmatprep.subr.mxu0 %v2155_v0 }
 0x37e   :  { %1910 = vmatpush3.msra.mxu0 %v2234_v4 }
 0x37f   :  { %1911 = vmatprep.subr.mxu0 %v2155_v0 }
 0x380   :  { %1912 = vmatpush3.msra.mxu0 %v2243_v8 }
 0x381   :  { %1913 = vmatprep.subr.mxu0 %v2155_v0 }
 0x382   :  { %1914 = vmatpush3.msra.mxu0 %v2249_v9 }
 0x383   :  { %1915 = vmatprep.subr.mxu0 %v2155_v0 }
 0x384   :  { %1916 = vmatpush3.msra.mxu0 %v2255_v10 }
 0x385   :  { %1917 = vmatprep.subr.mxu0 %v2155_v0 }
 0x386   :  { %1918 = vmatpush3.msra.mxu0 %v2261_v11 }
 0x387   :  { %1919 = vmatprep.subr.mxu0 %v2155_v0 }
 0x388   :  { %1920 = vmatpush3.msra.mxu0 %v2267_v12 }
 0x389   :  { %1921 = vmatprep.subr.mxu0 %v2155_v0 }
 0x38a   :  { %1922 = vmatpush3.msra.mxu0 %v2273_v13 }
 0x38b   :  { %1923 = vmatprep.subr.mxu0 %v2155_v0 }
 0x38c   :  { %1924 = vmatpush3.msra.mxu0 %v2279_v14 }
 0x38d   :  { %1925 = vmatprep.subr.mxu0 %v2155_v0 }
 0x38e   :  { %1926 = vmatpush3.msra.mxu0 %v2285_v15 }
 0x38f   :  { %1927 = vmatprep.subr.mxu0 %v2155_v0 }
 0x390   :  { %1928 = vmatpush3.msra.mxu0 %v2291_v16 }
 0x391   :  { %1929 = vmatprep.subr.mxu0 %v2155_v0 }
 0x392   :  { %1930 = vmatpush3.msra.mxu0 %v2297_v17 }
 0x393   :  { %1931 = vmatprep.subr.mxu0 %v2155_v0 }
 0x394   :  { %1932 = vmatpush3.msra.mxu0 %v2303_v18 }
 0x395   :  { %1933 = vmatprep.subr.mxu0 %v2155_v0 }
 0x396   :  { %1934 = vmatpush3.msra.mxu0 %v2309_v19 }
 0x397   :  { %1980 = vmatprep.subr.mxu0 %v2155_v0 }
 0x433   :  { %v856_v53 = vpop.f32.mrf.mxu0 }
 0x434   :  { %v930_v54 = vadd.f32 %v929_v50, %v856_v53 }
 0x435   :  { %v1853_v55 = vpop.f32.mrf.mxu0 }
 0x436   :  { %v934_v56 = vadd.f32 %v930_v54, %v2372_v25 }
 0x437   :  { %v1098_v57 = vpop.f32.mrf.mxu0 }
 0x438   :  { %937 = vst [vmem:[#allocation12 + $0x20] sm:$0xff] %v934_v56  ;;  %1894 = vmatmul.mubr.f32.vlgmr.msra.gmra.mxu1 %v934_v56 }
 0x439   :  { %1939 = vmatpush3.msra.mxu1 %v2236_v5  ;;  %1942 = vmatprep.mubr.msk.f32.mxu1 %vm2156_vm0, %v2155_v0  ;;  %v1902_v58 = vpop.f32.mrf.mxu0 }
 0x43a   :  { %1940 = vmatprep.subr.mxu1 %v2155_v0 }
 0x43b   :  { %1941 = vmatpush3.msra.mxu1 %v2240_v6 }
 0x43c   :  { %1945 = vmatprep.subr.mxu1 %v2155_v0  ;;  %1943 = vmatmul.mubr.msk.f32.vlgmr.msra.gmra.mxu1 %vm184_vm1, %v1109_v59 }
 0x43d   :  { %1946 = vmatpush3.msra.mxu1 %v2224_v1  ;;  %1977 = vmatprep.mubr.msk.f32.mxu1 %vm2156_vm0, %v2155_v0 }
 0x43e   :  { %1947 = vmatprep.subr.mxu1 %v2155_v0 }
 0x43f   :  { %1948 = vmatpush3.msra.mxu1 %v2226_v2 }
 0x440   :  { %1949 = vmatprep.subr.mxu1 %v2155_v0 }
 0x441   :  { %1950 = vmatpush3.msra.mxu1 %v2230_v3  ;;  %v1278_v3 = vld [vmem:[#allocation3 + $0x38] sm:$0xff] }
 0x442   :  { %1951 = vmatprep.subr.mxu1 %v2155_v0 }
 0x443   :  { %1952 = vmatpush3.msra.mxu1 %v2234_v4 }
 0x444   :  { %1953 = vmatprep.subr.mxu1 %v2155_v0 }
 0x445   :  { %1954 = vmatpush3.msra.mxu1 %v2243_v8 }
 0x446   :  { %1955 = vmatprep.subr.mxu1 %v2155_v0 }
 0x447   :  { %1956 = vmatpush3.msra.mxu1 %v2249_v9 }
 0x448   :  { %1957 = vmatprep.subr.mxu1 %v2155_v0 }
 0x449   :  { %1958 = vmatpush3.msra.mxu1 %v2255_v10 }
 0x44a   :  { %1959 = vmatprep.subr.mxu1 %v2155_v0 }
 0x44b   :  { %1960 = vmatpush3.msra.mxu1 %v2261_v11 }
 0x44c   :  { %1961 = vmatprep.subr.mxu1 %v2155_v0 }
 0x44d   :  { %1962 = vmatpush3.msra.mxu1 %v2267_v12 }
 0x44e   :  { %1963 = vmatprep.subr.mxu1 %v2155_v0 }
 0x44f   :  { %1964 = vmatpush3.msra.mxu1 %v2273_v13 }
 0x450   :  { %1965 = vmatprep.subr.mxu1 %v2155_v0 }
 0x451   :  { %1966 = vmatpush3.msra.mxu1 %v2279_v14 }
 0x452   :  { %1967 = vmatprep.subr.mxu1 %v2155_v0 }
 0x453   :  { %1968 = vmatpush3.msra.mxu1 %v2285_v15 }
 0x454   :  { %1969 = vmatprep.subr.mxu1 %v2155_v0 }
 0x455   :  { %1970 = vmatpush3.msra.mxu1 %v2291_v16 }
 0x456   :  { %1971 = vmatprep.subr.mxu1 %v2155_v0 }
 0x457   :  { %1972 = vmatpush3.msra.mxu1 %v2297_v17 }
 0x458   :  { %1973 = vmatprep.subr.mxu1 %v2155_v0 }
 0x459   :  { %1974 = vmatpush3.msra.mxu1 %v2303_v18 }
 0x45a   :  { %1975 = vmatprep.subr.mxu1 %v2155_v0 }
 0x45b   :  { %1976 = vmatpush3.msra.mxu1 %v2309_v19 }
 0x4f8   :  { %v1025_v60 = vpop.f32.mrf.mxu1 }
 0x4f9   :  { %v1099_v61 = vadd.f32 %v1098_v57, %v1025_v60 }
 0x4fa   :  { %v1895_v62 = vpop.f32.mrf.mxu1 }
 0x4fb   :  { %v1103_v63 = vadd.f32 %v1099_v61, %v2372_v25 }
 0x4fc   :  { %v1267_v1 = vpop.f32.mrf.mxu1 }
 0x4fd   :  { %1106 = vst [vmem:[#allocation12 + $0x28] sm:$0xff] %v1103_v63  ;;  %1936 = vmatmul.mubr.f32.vlgmr.msra.gmra.mxu0 %v1103_v63 }
 0x4fe   :  { %1981 = vmatpush3.msra.mxu0 %v2236_v5  ;;  %1984 = vmatprep.mubr.msk.f32.mxu0 %vm2156_vm0, %v2155_v0  ;;  %v1944_v2 = vpop.f32.mrf.mxu1 }
 0x4ff   :  { %1982 = vmatprep.subr.mxu0 %v2155_v0 }
 0x500   :  { %1983 = vmatpush3.msra.mxu0 %v2240_v6 }
 0x501   :  { %1985 = vmatmul.mubr.msk.f32.vlgmr.msra.gmra.mxu0 %vm184_vm1, %v1278_v3 }
 0x5bd   :  { %v1194_v4 = vpop.f32.mrf.mxu0 }
 0x5be   :  { %v1268_v7 = vadd.f32 %v1267_v1, %v1194_v4 }
 0x5bf   :  { %v1937_v8 = vpop.f32.mrf.mxu0 }
 0x5c0   :  { %v1272_v9 = vadd.f32 %v1268_v7, %v2372_v25 }
 0x5c1   :  { %v1436_v5 = vpop.f32.mrf.mxu0 }
 0x5c2   :  { %1275 = vst [vmem:[#allocation12 + $0x30] sm:$0xff] %v1272_v9  ;;  %1978 = vmatmul.mubr.f32.vlgmr.msra.gmra.mxu1 %v1272_v9 }
 0x5c3   :  { %v1986_v10 = vpop.f32.mrf.mxu0 }
 0x682   :  { %v1363_v11 = vpop.f32.mrf.mxu1 }
 0x683   :  { %v1437_v0 = vadd.f32 %v1436_v5, %v1363_v11 }
 0x684   :  { %v1979_v6 = vpop.f32.mrf.mxu1 }
 0x685   :  { %v1441_v12 = vadd.f32 %v1437_v0, %v2372_v25 }
 0x687   :  { %1444 = vst [vmem:[#allocation12 + $0x38] sm:$0xff] %v1441_v12  ;;  %1449 = vst [vmem:[#allocation13] sm:$0xff] %v1441_v12 }
 0x688   :  { %2109 = shalt.err (!%p2106_p1)
}
 0x689   :  { %1461 = dma.vmem_to_hbm [thread:$0]  %s1456_s4, 1024, %s2606_s5, [#allocation5], %s2151_s7, %s2151_s7, %s2152_s8  }
 0x68a   :  { %s2118_s26 = scalar_lea.vmem %s1469_s22, 128  ;;  %p2123_p3 = scmp.lt.s32.totalorder %s1469_s22, %s1469_s22 }
 0x68b   :  { %p2119_p2 = scmp.ne.s32.totalorder %s1469_s22, %s2118_s26  ;;  %p2124_p4 = scmp.lt.s32.totalorder %s2118_s26, %s2118_s26 }
 0x68d   :  { %p2125_p5 = por %p2124_p4, %p2123_p3 }
 0x68f   :  { %p2126_p6 = pnand %p2125_p5, %p2119_p2 }
 0x691   :  { %2129 = shalt.err (!%p2126_p6)
}
 0x692   :  { %1471 = dma.vmem_to_hbm [thread:$0]  %s1469_s22, 128, %s2607_s6, [#allocation14]  }
 0x693   :  { %2144 = dma.done.wait [#allocation5], 1024  }
 0x694   :  { %2145 = vsyncadd [#allocation5], 4294966272 }
 0x695   :  { %2146 = dma.done.wait [#allocation14], 128  }
 0x696   :  { %2147 = vsyncadd [#allocation14], 4294967168 }
 0x697   :  { %1478 = vsyncpa [#allocation4], 1 }
 0x698   :  { %1479 = vsyncpa [#allocation7], 1 }
 0x699   :  { %1480 = vsyncpa [#allocation10], 1 }
 0x69a   :  { %1481 = vsyncpa [#allocation5], 1 }
 0x69b   :  { %1482 = vsyncpa [#allocation14], 1 }

</bundles_post_ra>
